<compile_context>
chip_gen: v6e
topology: v6e:2x2x1
jax: 0.10.0
libtpu: 0.0.40
codegen_flags: <defaults>
</compile_context>

<pallas_src>
import functools

import jax
import jax.numpy as jnp
from jax.experimental import pallas as pl
from jax.experimental.pallas import tpu as pltpu


def _frame_nce_kernel(m_ref, mt_ref, eye_ref, ctx_ref, q_ref, out_ref):
    """One block of GT independent (contexts, queries) pairs per grid step.

    m_ref  : (B*L, B) f32 one-hot block membership, M[k, i] = 1 iff k // L == i
    mt_ref : (B, B*L) f32 = M.T  (diag-block mask per context row)
    eye_ref: (B, B)   f32 identity
    ctx_ref: (GT, B, D)    contexts (compute dtype, e.g. bf16)
    q_ref  : (GT, B*L, D)  queries  (compute dtype, natural layout — no transpose)
    out_ref: (GT, 1)  per-pair mean-reduced loss
    """
    GT, B, _ = ctx_ref.shape
    BL = q_ref.shape[1]

    # ---- scores x[g, i, k] = <ctx[g, i], qry[g, k]> (contract on D, MXU, f32 acc)
    x = jnp.einsum("gbd,gkd->gbk", ctx_ref[...], q_ref[...],
                   preferred_element_type=jnp.float32)           # (GT, B, BL)

    mtf = mt_ref[...]                                            # (B, BL)
    eyef = eye_ref[...]                                          # (B, B)
    in_diag = (mtf > 0.0)[None]                                  # (1, B, BL) bool

    # ---- per-row max and per-row diagonal-block max -------------------------
    r = jnp.max(x, axis=2, keepdims=True)                        # (GT, B, 1)
    dmax = jnp.max(jnp.where(in_diag, x, jnp.float32(-1e30)),
                   axis=2, keepdims=True)                        # (GT, B, 1)

    # ---- single full-size exp pass -------------------------------------------
    # Diagonal-block entries are shifted by their own block max (nominator can
    # never underflow); all other entries by the row max (denominator LSE shift).
    shift = jnp.where(in_diag, dmax, r)                          # (GT, B, BL)
    e = jnp.exp(x - shift)                                       # only full-size EUP pass

    # ---- block-structured sums folded into one small MXU matmul against M ----
    S = jnp.dot(e.reshape(GT * B, BL), m_ref[...],
                preferred_element_type=jnp.float32).reshape(GT, B, B)

    # nominator[i] = logsumexp_l x[i, i*L + l]   (shifted by its own block max)
    diag_S = jnp.sum(S * eyef[None], axis=2, keepdims=True)      # (GT, B, 1) = S[:, i, i]
    nominator = dmax + jnp.log(diag_S)                           # (GT, B, 1), diag_S >= 1

    # Re-express the diagonal entries with the row-max shift (exp(dmax - r) <= 1)
    # so every S_r[g, j, i] == sum_{k in block i} exp(x[g, j, k] - r[g, j]).
    scale = jnp.exp(dmax - r)                                    # (GT, B, 1)
    S_r = S * (1.0 + eyef[None] * (scale - 1.0))                 # (GT, B, B)
    RS = jnp.sum(S_r, axis=2, keepdims=True)                     # (GT, B, 1) full-row sums

    # denominator[i] = logsumexp over (row i) ∪ (block-column i); the diagonal
    # block is intentionally counted twice (torch.cat semantics).
    T = r + jnp.log(S_r + eyef[None] * RS)                       # (GT, B, B)
    cmax = jnp.max(T, axis=1, keepdims=True)                     # (GT, 1, B), always finite
    denominator = cmax + jnp.log(
        jnp.sum(jnp.exp(T - cmax), axis=1, keepdims=True))       # (GT, 1, B)

    # mean(denominator - nominator): the two sides can be summed independently.
    sum_den = jnp.sum(denominator, axis=2)                       # (GT, 1)
    sum_nom = jnp.sum(nominator, axis=1)                         # (GT, 1)
    out_ref[...] = (sum_den - sum_nom) * jnp.float32(1.0 / B)


@functools.partial(jax.jit, static_argnames=("L", "compute_dtype", "group_block"))
def frame_nce_batched(contexts, queries, L, *, compute_dtype=jnp.bfloat16,
                      group_block=8):
    """Batched frame_nce(reduction='mean').

    contexts: (G, B, D), queries: (G, B*L, D) -> (G,) per-pair losses.
    Each grid step processes `GT = min(group_block, G)` pairs; choose
    group_block so that ceil(G/GT) >= 2 on v7x to keep both TensorCores busy,
    and ~2x larger on v5e/v6e (128 MiB VMEM) than on v7x (64 MiB).
    """
    G, B, D = contexts.shape
    BL = queries.shape[1]
    assert queries.shape[0] == G and BL == B * L

    GT = min(group_block, G)
    n_blocks = pl.cdiv(G, GT)
    G_pad = n_blocks * GT

    # bf16 halves HBM traffic / VMEM footprint; both in-kernel dots accumulate f32.
    ctx = contexts.astype(compute_dtype)
    qry = queries.astype(compute_dtype)
    if G_pad != G:
        ctx = jnp.pad(ctx, ((0, G_pad - G), (0, 0), (0, 0)))
        qry = jnp.pad(qry, ((0, G_pad - G), (0, 0), (0, 0)))

    # Small constants built once in XLA (constant-folded under jit) and streamed
    # into VMEM once: constant block index => never re-fetched across the grid.
    m = (jnp.arange(BL, dtype=jnp.int32)[:, None] // L
         == jnp.arange(B, dtype=jnp.int32)[None, :]).astype(jnp.float32)  # (BL, B)
    mt = m.T                                                               # (B, BL)
    eye = jnp.eye(B, dtype=jnp.float32)                                    # (B, B)

    out = pl.pallas_call(
        _frame_nce_kernel,
        out_shape=jax.ShapeDtypeStruct((n_blocks, GT, 1), jnp.float32),
        grid=(n_blocks,),
        in_specs=[
            pl.BlockSpec((BL, B), lambda g: (0, 0)),       # M      (constant)
            pl.BlockSpec((B, BL), lambda g: (0, 0)),       # M.T    (constant)
            pl.BlockSpec((B, B), lambda g: (0, 0)),        # eye    (constant)
            pl.BlockSpec((GT, B, D), lambda g: (g, 0, 0)),  # contexts block
            pl.BlockSpec((GT, BL, D), lambda g: (g, 0, 0)),  # queries block
        ],
        out_specs=pl.BlockSpec((None, GT, 1), lambda g: (g, 0, 0)),
        compiler_params=pltpu.CompilerParams(
            dimension_semantics=("parallel",),
        ),
    )(m, mt, eye, ctx, qry)
    return out.reshape(G_pad)[:G]


def frame_nce(contexts, queries, L, **kwargs):
    """Single-pair frame_nce(reduction='mean'): contexts (B, D), queries (B*L, D)."""
    return frame_nce_batched(contexts[None], queries[None], L=L, **kwargs)[0]


def frame_nce_ref(contexts, queries, L):
    """Pure-JAX reference mirroring the PyTorch module exactly."""
    B = contexts.shape[0]
    x = contexts @ queries.T                                   # (B, B*L)
    x3 = x.reshape(B, B, L)
    nom = jnp.sum(x3 * jnp.eye(B, dtype=jnp.float32)[:, :, None], axis=1)
    nom = jax.scipy.special.logsumexp(nom, axis=1)
    den = jnp.concatenate([x3, jnp.transpose(x3, (1, 0, 2))], axis=1).reshape(B, -1)
    den = jax.scipy.special.logsumexp(den, axis=1)
    return jnp.mean(den - nom)


if __name__ == "__main__":
    import numpy as np

    B, L, D = 8, 16, 32          # batch=8, 16 frames per query, hidden=32
    key = jax.random.PRNGKey(0)
    kc, kq = jax.random.split(key)
    contexts = jax.random.normal(kc, (B, D), dtype=jnp.float32)
    queries = jax.random.normal(kq, (B * L, D), dtype=jnp.float32)

    # f32 compute path: matches the f32 reference tightly.
    loss_f32 = jax.block_until_ready(
        frame_nce(contexts, queries, L, compute_dtype=jnp.float32))
    ref_f32 = jax.block_until_ready(frame_nce_ref(contexts, queries, L))
    np.testing.assert_allclose(np.asarray(loss_f32), np.asarray(ref_f32),
                               rtol=1e-5, atol=1e-4)

    # bf16 compute path (default): compare against the reference evaluated on the
    # same bf16-quantized inputs (kernel accumulation / LSE math stays f32).
    ctx_bf = contexts.astype(jnp.bfloat16).astype(jnp.float32)
    qry_bf = queries.astype(jnp.bfloat16).astype(jnp.float32)
    loss_bf16 = jax.block_until_ready(frame_nce(contexts, queries, L))
    ref_bf16 = jax.block_until_ready(frame_nce_ref(ctx_bf, qry_bf, L))
    np.testing.assert_allclose(np.asarray(loss_bf16), np.asarray(ref_bf16),
                               rtol=1e-4, atol=1e-3)

    # Batched path: several independent pairs per pallas_call; group_block=2
    # exercises group blocking, the multi-step parallel grid and padding (G=5).
    G = 5
    kcb, kqb = jax.random.split(jax.random.PRNGKey(1))
    ctx_b = jax.random.normal(kcb, (G, B, D), dtype=jnp.float32)
    qry_b = jax.random.normal(kqb, (G, B * L, D), dtype=jnp.float32)
    losses = jax.block_until_ready(
        frame_nce_batched(ctx_b, qry_b, L=L, compute_dtype=jnp.float32,
                          group_block=2))
    refs = jnp.stack([frame_nce_ref(ctx_b[g], qry_b[g], L) for g in range(G)])
    np.testing.assert_allclose(np.asarray(losses), np.asarray(refs),
                               rtol=1e-5, atol=1e-4)

    print("KERNEL_OK")
</pallas_src>

<mosaic_0001>
module attributes {stable_mosaic.version = 11 : i64} {
  func.func @_frame_nce_kernel(%arg0: i32, %arg1: memref<128x8xf32, #tpu.memory_space<vmem>>, %arg2: memref<8x128xf32, #tpu.memory_space<vmem>>, %arg3: memref<8x8xf32, #tpu.memory_space<vmem>>, %arg4: memref<1x8x32xf32, #tpu.memory_space<vmem>>, %arg5: memref<1x128x32xf32, #tpu.memory_space<vmem>>, %arg6: memref<1x1x1xf32, #tpu.memory_space<vmem>>) attributes {dimension_semantics = [#tpu.dimension_semantics<parallel>], iteration_bounds = array<i64: 1>, scalar_prefetch = 0 : i64, scratch_operands = 0 : i64, tpu.core_type = #tpu.core_type<tc>, window_params = [{pipeline_mode = #tpu.pipeline_mode<synchronous>, transform_indices = @transform_0, window_bounds = array<i64: 128, 8>}, {pipeline_mode = #tpu.pipeline_mode<synchronous>, transform_indices = @transform_1, window_bounds = array<i64: 8, 128>}, {pipeline_mode = #tpu.pipeline_mode<synchronous>, transform_indices = @transform_2, window_bounds = array<i64: 8, 8>}, {transform_indices = @transform_3, window_bounds = array<i64: 1, 8, 32>}, {transform_indices = @transform_4, window_bounds = array<i64: 1, 128, 32>}, {transform_indices = @transform_5, window_bounds = array<i64: 1, 1, 1>}]} {
    %c0 = arith.constant 0 : index
    %c0_0 = arith.constant 0 : index
    %c0_1 = arith.constant 0 : index
    %0 = vector.load %arg4[%c0, %c0_0, %c0_1] : memref<1x8x32xf32, #tpu.memory_space<vmem>>, vector<1x8x32xf32>
    %c0_2 = arith.constant 0 : index
    %c0_3 = arith.constant 0 : index
    %c0_4 = arith.constant 0 : index
    %1 = vector.load %arg5[%c0_2, %c0_3, %c0_4] : memref<1x128x32xf32, #tpu.memory_space<vmem>>, vector<1x128x32xf32>
    "tpu.trace_start"() <{level = 10 : i32, message = "gbd,gkd->gbk"}> : () -> ()
    %cst = arith.constant dense<0.000000e+00> : vector<1x8x128xf32>
    %2 = tpu.matmul %0, %1, %cst {dimension_numbers = #tpu.dot_dimension_numbers<[2], [2], [1], [1], [0, 0, 0, 1, 1, 1], [0], [0]>} : vector<1x8x32xf32>, vector<1x128x32xf32>, vector<1x8x128xf32> -> vector<1x8x128xf32>
    "tpu.trace_stop"() : () -> ()
    %c0_5 = arith.constant 0 : index
    %c0_6 = arith.constant 0 : index
    %3 = vector.load %arg2[%c0_5, %c0_6] : memref<8x128xf32, #tpu.memory_space<vmem>>, vector<8x128xf32>
    %c0_7 = arith.constant 0 : index
    %c0_8 = arith.constant 0 : index
    %4 = vector.load %arg3[%c0_7, %c0_8] : memref<8x8xf32, #tpu.memory_space<vmem>>, vector<8x8xf32>
    %cst_9 = arith.constant 0.000000e+00 : f32
    %5 = vector.broadcast %cst_9 : f32 to vector<8x128xf32>
    %6 = arith.cmpf ogt, %3, %5 : vector<8x128xf32>
    %7 = vector.shape_cast %6 : vector<8x128xi1> to vector<1x8x128xi1>
    %cst_10 = arith.constant dense<0xFF800000> : vector<1x8xf32>
    %8 = vector.multi_reduction <maximumf>, %2, %cst_10 [2] : vector<1x8x128xf32> to vector<1x8xf32>
    %9 = vector.shape_cast %8 : vector<1x8xf32> to vector<1x8x1xf32>
    %cst_11 = arith.constant -1.000000e+30 : f32
    %10 = vector.broadcast %cst_11 : f32 to vector<1x8x128xf32>
    %11 = arith.select %7, %2, %10 : vector<1x8x128xi1>, vector<1x8x128xf32>
    %cst_12 = arith.constant dense<0xFF800000> : vector<1x8xf32>
    %12 = vector.multi_reduction <maximumf>, %11, %cst_12 [2] : vector<1x8x128xf32> to vector<1x8xf32>
    %13 = vector.shape_cast %12 : vector<1x8xf32> to vector<1x8x1xf32>
    %14 = vector.shape_cast %13 : vector<1x8x1xf32> to vector<1x8x1xf32>
    %15 = vector.broadcast %14 : vector<1x8x1xf32> to vector<1x8x128xf32>
    %16 = vector.shape_cast %9 : vector<1x8x1xf32> to vector<1x8x1xf32>
    %17 = vector.broadcast %16 : vector<1x8x1xf32> to vector<1x8x128xf32>
    %18 = arith.select %7, %15, %17 : vector<1x8x128xi1>, vector<1x8x128xf32>
    %19 = arith.subf %2, %18 : vector<1x8x128xf32>
    %20 = math.exp %19 : vector<1x8x128xf32>
    %21 = vector.shape_cast %20 : vector<1x8x128xf32> to vector<8x128xf32>
    %c0_13 = arith.constant 0 : index
    %c0_14 = arith.constant 0 : index
    %22 = vector.load %arg1[%c0_13, %c0_14] : memref<128x8xf32, #tpu.memory_space<vmem>>, vector<128x8xf32>
    %cst_15 = arith.constant dense<0.000000e+00> : vector<8x8xf32>
    %23 = tpu.matmul %21, %22, %cst_15 {dimension_numbers = #tpu.dot_dimension_numbers<[1], [0], [0], [1], [0, 0, 1, 1], [], []>} : vector<8x128xf32>, vector<128x8xf32>, vector<8x8xf32> -> vector<8x8xf32>
    %24 = vector.shape_cast %23 : vector<8x8xf32> to vector<1x8x8xf32>
    %25 = vector.shape_cast %4 : vector<8x8xf32> to vector<1x8x8xf32>
    %26 = arith.mulf %24, %25 : vector<1x8x8xf32>
    %cst_16 = arith.constant dense<0.000000e+00> : vector<1x8xf32>
    %27 = vector.multi_reduction <add>, %26, %cst_16 [2] : vector<1x8x8xf32> to vector<1x8xf32>
    %28 = vector.shape_cast %27 : vector<1x8xf32> to vector<1x8x1xf32>
    %29 = math.log %28 : vector<1x8x1xf32>
    %30 = arith.addf %13, %29 : vector<1x8x1xf32>
    %31 = arith.subf %13, %9 : vector<1x8x1xf32>
    %32 = math.exp %31 : vector<1x8x1xf32>
    %33 = vector.shape_cast %4 : vector<8x8xf32> to vector<1x8x8xf32>
    %cst_17 = arith.constant 1.000000e+00 : f32
    %34 = vector.broadcast %cst_17 : f32 to vector<1x8x1xf32>
    %35 = arith.subf %32, %34 : vector<1x8x1xf32>
    %36 = vector.broadcast %35 : vector<1x8x1xf32> to vector<1x8x8xf32>
    %37 = arith.mulf %33, %36 : vector<1x8x8xf32>
    %cst_18 = arith.constant 1.000000e+00 : f32
    %38 = vector.broadcast %cst_18 : f32 to vector<1x8x8xf32>
    %39 = arith.addf %38, %37 : vector<1x8x8xf32>
    %40 = arith.mulf %24, %39 : vector<1x8x8xf32>
    %cst_19 = arith.constant dense<0.000000e+00> : vector<1x8xf32>
    %41 = vector.multi_reduction <add>, %40, %cst_19 [2] : vector<1x8x8xf32> to vector<1x8xf32>
    %42 = vector.shape_cast %41 : vector<1x8xf32> to vector<1x8x1xf32>
    %43 = vector.shape_cast %4 : vector<8x8xf32> to vector<1x8x8xf32>
    %44 = vector.broadcast %42 : vector<1x8x1xf32> to vector<1x8x8xf32>
    %45 = arith.mulf %43, %44 : vector<1x8x8xf32>
    %46 = arith.addf %40, %45 : vector<1x8x8xf32>
    %47 = math.log %46 : vector<1x8x8xf32>
    %48 = vector.broadcast %9 : vector<1x8x1xf32> to vector<1x8x8xf32>
    %49 = arith.addf %48, %47 : vector<1x8x8xf32>
    %cst_20 = arith.constant dense<0xFF800000> : vector<1x8xf32>
    %50 = vector.multi_reduction <maximumf>, %49, %cst_20 [1] : vector<1x8x8xf32> to vector<1x8xf32>
    %51 = vector.shape_cast %50 : vector<1x8xf32> to vector<1x1x8xf32>
    %52 = vector.broadcast %51 : vector<1x1x8xf32> to vector<1x8x8xf32>
    %53 = arith.subf %49, %52 : vector<1x8x8xf32>
    %54 = math.exp %53 : vector<1x8x8xf32>
    %cst_21 = arith.constant dense<0.000000e+00> : vector<1x8xf32>
    %55 = vector.multi_reduction <add>, %54, %cst_21 [1] : vector<1x8x8xf32> to vector<1x8xf32>
    %56 = vector.shape_cast %55 : vector<1x8xf32> to vector<1x1x8xf32>
    %57 = math.log %56 : vector<1x1x8xf32>
    %58 = arith.addf %51, %57 : vector<1x1x8xf32>
    %cst_22 = arith.constant dense<0.000000e+00> : vector<1x1xf32>
    %59 = vector.multi_reduction <add>, %58, %cst_22 [2] : vector<1x1x8xf32> to vector<1x1xf32>
    %cst_23 = arith.constant dense<0.000000e+00> : vector<1x1xf32>
    %60 = vector.multi_reduction <add>, %30, %cst_23 [1] : vector<1x8x1xf32> to vector<1x1xf32>
    %61 = arith.subf %59, %60 : vector<1x1xf32>
    %cst_24 = arith.constant 1.250000e-01 : f32
    %62 = vector.broadcast %cst_24 : f32 to vector<1x1xf32>
    %63 = arith.mulf %61, %62 : vector<1x1xf32>
    %c0_25 = arith.constant 0 : index
    %c0_26 = arith.constant 0 : index
    %c0_27 = arith.constant 0 : index
    %64 = vector.load %arg6[%c0_25, %c0_26, %c0_27] : memref<1x1x1xf32, #tpu.memory_space<vmem>>, vector<1x1x1xf32>
    %65 = vector.shape_cast %64 : vector<1x1x1xf32> to vector<1x1xf32>
    %66 = vector.shape_cast %63 : vector<1x1xf32> to vector<1x1x1xf32>
    tpu.vector_store %arg6[%c0_25, %c0_26, %c0_27], %66 {strides = array<i32>} : memref<1x1x1xf32, #tpu.memory_space<vmem>>, vector<1x1x1xf32>,
    return
  }
  func.func @transform_0(%arg0: i32) -> (i32, i32) {
    %c0_i32 = arith.constant 0 : i32
    %c0_i32_0 = arith.constant 0 : i32
    %c0_i32_1 = arith.constant 0 : i32
    return %c0_i32, %c0_i32_0 : i32, i32
  }
  func.func @transform_1(%arg0: i32) -> (i32, i32) {
    %c0_i32 = arith.constant 0 : i32
    %c0_i32_0 = arith.constant 0 : i32
    %c0_i32_1 = arith.constant 0 : i32
    return %c0_i32, %c0_i32_0 : i32, i32
  }
  func.func @transform_2(%arg0: i32) -> (i32, i32) {
    %c0_i32 = arith.constant 0 : i32
    %c0_i32_0 = arith.constant 0 : i32
    %c0_i32_1 = arith.constant 0 : i32
    return %c0_i32, %c0_i32_0 : i32, i32
  }
  func.func @transform_3(%arg0: i32) -> (i32, i32, i32) {
    %c0_i32 = arith.constant 0 : i32
    %c0_i32_0 = arith.constant 0 : i32
    %c0_i32_1 = arith.constant 0 : i32
    return %arg0, %c0_i32, %c0_i32_0 : i32, i32, i32
  }
  func.func @transform_4(%arg0: i32) -> (i32, i32, i32) {
    %c0_i32 = arith.constant 0 : i32
    %c0_i32_0 = arith.constant 0 : i32
    %c0_i32_1 = arith.constant 0 : i32
    return %arg0, %c0_i32, %c0_i32_0 : i32, i32, i32
  }
  func.func @transform_5(%arg0: i32) -> (i32, i32, i32) {
    %c0_i32 = arith.constant 0 : i32
    %c0_i32_0 = arith.constant 0 : i32
    %c0_i32_1 = arith.constant 0 : i32
    return %arg0, %c0_i32, %c0_i32_0 : i32, i32, i32
  }
}

</mosaic_0001>

<bundles_post_ra>
// kernel: frame_nce_batched.1
= control target key start
LH: loop header
LB: loop body
LE: loop exit
PB: predicated region body
PF: predicated region fallthrough
CT: control target
= control target key end

     0   :  { %vm38_vm0 = vcmask 261120   ;;  %v487_v1 = vmov 0.0   ;;  %vm488_vm1 = vmmov 0   ;;  %s686_s0 = inlined_call_operand.vmem [shape: f32[128,8], index: 0, kind: input, shape index: {}]   ;;  %s687_s1 = inlined_call_operand.vmem [shape: f32[8,128], index: 1, kind: input, shape index: {}]   ;;  %s688_s2 = inlined_call_operand.vmem [shape: f32[8,8], index: 2, kind: input, shape index: {}]   ;;  %s689_s3 = inlined_call_operand.vmem [shape: f32[1,8,32], index: 3, kind: input, shape index: {}]   ;;  %s690_s4 = inlined_call_operand.vmem [shape: f32[1,128,32], index: 4, kind: input, shape index: {}]   ;;  %s691_s5 = inlined_call_operand.hbm [shape: f32[1,1,1], index: 5, kind: output, shape index: {}]  }
   0x1   :  { %v37_v0 = vld [vmem:[%s690_s4 + $0x78] sm:$0xff]  ;;  %380 = vmatprep.subr.mxu0 %v487_v1  ;;  %412 = vmatprep.mubr.msk.f32.mxu0 %vm488_vm1, %v487_v1  ;;  %v36_v2 = vld [vmem:[%s690_s4 + $0x70] sm:$0xff] }
   0x2   :  { %381 = vmatpush3.xpose.msk.msra.mxu0 %vm38_vm0, %v37_v0  ;;  %415 = vmatprep.subr.mxu1 %v487_v1 }
   0x3   :  { %382 = vmatprep.subr.mxu0 %v487_v1  ;;  %447 = vmatprep.mubr.msk.f32.mxu1 %vm488_vm1, %v487_v1 }
   0x4   :  { %10 = vsyncpa [#allocation3], 0  ;;  %v35_v3 = vld [vmem:[%s690_s4 + $0x68] sm:$0xff]  ;;  %v34_v4 = vld [vmem:[%s690_s4 + $0x60] sm:$0xff]  ;;  %vm259_vm3 = vcmask 64512   ;;  %vm312_vm4 = vcmask 0  }
   0x5   :  { %v33_v5 = vld [vmem:[%s690_s4 + $0x58] sm:$0xff]  ;;  %v32_v6 = vld [vmem:[%s690_s4 + $0x50] sm:$0xff]  ;;  %v31_v7 = vld [vmem:[%s690_s4 + $0x48] sm:$0xff] }
   0x6   :  { %383 = vmatpush3.xpose.msk.msra.mxu0 %vm38_vm0, %v36_v2  ;;  %v30_v8 = vld [vmem:[%s690_s4 + $0x40] sm:$0xff]  ;;  %v29_v9 = vld [vmem:[%s690_s4 + $0x38] sm:$0xff]  ;;  %v28_v10 = vld [vmem:[%s690_s4 + $0x30] sm:$0xff] }
   0x7   :  { %384 = vmatprep.subr.mxu0 %v487_v1  ;;  %v27_v11 = vld [vmem:[%s690_s4 + $0x28] sm:$0xff]  ;;  %v26_v12 = vld [vmem:[%s690_s4 + $0x20] sm:$0xff]  ;;  %v25_v13 = vld [vmem:[%s690_s4 + $0x18] sm:$0xff] }
   0x8   :  { %v24_v14 = vld [vmem:[%s690_s4 + $0x10] sm:$0xff]  ;;  %v23_v15 = vld [vmem:[%s690_s4 + $0x8] sm:$0xff]  ;;  %v22_v16 = vld [vmem:[%s690_s4] sm:$0xff] }
   0x9   :  { %v21_v17 = vld [vmem:[%s689_s3] sm:$0xff]  ;;  %v187_v18 = vld [vmem:[%s686_s0 + $0x78] sm:$0xff]  ;;  %v186_v19 = vld [vmem:[%s686_s0 + $0x70] sm:$0xff] }
   0xa   :  { %385 = vmatpush3.xpose.msk.msra.mxu0 %vm38_vm0, %v35_v3  ;;  %416 = vmatpush3.msra.mxu1 %v187_v18  ;;  %v185_v20 = vld [vmem:[%s686_s0 + $0x68] sm:$0xff]  ;;  %v184_v21 = vld [vmem:[%s686_s0 + $0x60] sm:$0xff]  ;;  %v183_v26 = vld [vmem:[%s686_s0 + $0x58] sm:$0xff] }
   0xb   :  { %386 = vmatprep.subr.mxu0 %v487_v1  ;;  %417 = vmatprep.subr.mxu1 %v487_v1  ;;  %v160_v22 = vld [vmem:[%s687_s1] sm:$0xff]  ;;  %v182_v27 = vld [vmem:[%s686_s0 + $0x50] sm:$0xff]  ;;  %v181_v28 = vld [vmem:[%s686_s0 + $0x48] sm:$0xff] }
   0xc   :  { %418 = vmatpush3.msra.mxu1 %v186_v19  ;;  %vm162_vm2 = vcmp.gt.f32.partialorder %v160_v22, 0.0  ;;  %v180_v29 = vld [vmem:[%s686_s0 + $0x40] sm:$0xff]  ;;  %v179_v30 = vld [vmem:[%s686_s0 + $0x38] sm:$0xff]  ;;  %v178_v31 = vld [vmem:[%s686_s0 + $0x30] sm:$0xff] }
   0xd   :  { %419 = vmatprep.subr.mxu1 %v487_v1  ;;  %v177_v32 = vld [vmem:[%s686_s0 + $0x28] sm:$0xff]  ;;  %v176_v33 = vld [vmem:[%s686_s0 + $0x20] sm:$0xff]  ;;  %v175_v34 = vld [vmem:[%s686_s0 + $0x18] sm:$0xff] }
   0xe   :  { %387 = vmatpush3.xpose.msk.msra.mxu0 %vm38_vm0, %v34_v4  ;;  %420 = vmatpush3.msra.mxu1 %v185_v20  ;;  %v174_v35 = vld [vmem:[%s686_s0 + $0x10] sm:$0xff]  ;;  %v173_v36 = vld [vmem:[%s686_s0 + $0x8] sm:$0xff]  ;;  %v172_v37 = vld [vmem:[%s686_s0] sm:$0xff] }
   0xf   :  { %388 = vmatprep.subr.mxu0 %v487_v1  ;;  %421 = vmatprep.subr.mxu1 %v487_v1  ;;  %v161_v48 = vld [vmem:[%s688_s2] sm:$0xff]  ;;  %s489_s2 = smov [#allocation2]  }
  0x10   :  { %422 = vmatpush3.msra.mxu1 %v184_v21  ;;  %s320_s7 = sshll.u32 %s489_s2, 4  ;;  %s321_s7 = int_to_ptr.vmem [resolvable:$true] %s320_s7 }
  0x11   :  { %423 = vmatprep.subr.mxu1 %v487_v1  ;;  %s465_s8 = scalar_lea.vmem %s321_s7, 16  ;;  %s469_s9 = scalar_lea.vmem %s321_s7, 32 }
  0x12   :  { %389 = vmatpush3.xpose.msk.msra.mxu0 %vm38_vm0, %v33_v5  ;;  %424 = vmatpush3.msra.mxu1 %v183_v26  ;;  %p466_p0 = scmp.ne.s32.totalorder %s321_s7, %s465_s8  ;;  %p470_p1 = scmp.lt.s32.totalorder %s321_s7, %s321_s7 }
  0x13   :  { %390 = vmatprep.subr.mxu0 %v487_v1  ;;  %425 = vmatprep.subr.mxu1 %v487_v1  ;;  %p471_p2 = scmp.lt.s32.totalorder %s469_s9, %s465_s8 }
  0x14   :  { %426 = vmatpush3.msra.mxu1 %v182_v27 }
  0x15   :  { %427 = vmatprep.subr.mxu1 %v487_v1  ;;  %p472_p3 = por %p471_p2, %p470_p1 }
  0x16   :  { %391 = vmatpush3.xpose.msk.msra.mxu0 %vm38_vm0, %v32_v6  ;;  %428 = vmatpush3.msra.mxu1 %v181_v28 }
  0x17   :  { %392 = vmatprep.subr.mxu0 %v487_v1  ;;  %429 = vmatprep.subr.mxu1 %v487_v1  ;;  %p473_p4 = pnand %p472_p3, %p466_p0 }
  0x18   :  { %430 = vmatpush3.msra.mxu1 %v180_v29 }
  0x19   :  { %431 = vmatprep.subr.mxu1 %v487_v1 }
  0x1a   :  { %393 = vmatpush3.xpose.msk.msra.mxu0 %vm38_vm0, %v31_v7  ;;  %432 = vmatpush3.msra.mxu1 %v179_v30 }
  0x1b   :  { %394 = vmatprep.subr.mxu0 %v487_v1  ;;  %433 = vmatprep.subr.mxu1 %v487_v1 }
  0x1c   :  { %434 = vmatpush3.msra.mxu1 %v178_v31 }
  0x1d   :  { %435 = vmatprep.subr.mxu1 %v487_v1 }
  0x1e   :  { %395 = vmatpush3.xpose.msk.msra.mxu0 %vm38_vm0, %v30_v8  ;;  %436 = vmatpush3.msra.mxu1 %v177_v32 }
  0x1f   :  { %396 = vmatprep.subr.mxu0 %v487_v1  ;;  %437 = vmatprep.subr.mxu1 %v487_v1 }
  0x20   :  { %438 = vmatpush3.msra.mxu1 %v176_v33 }
  0x21   :  { %439 = vmatprep.subr.mxu1 %v487_v1 }
  0x22   :  { %397 = vmatpush3.xpose.msk.msra.mxu0 %vm38_vm0, %v29_v9  ;;  %440 = vmatpush3.msra.mxu1 %v175_v34 }
  0x23   :  { %398 = vmatprep.subr.mxu0 %v487_v1  ;;  %441 = vmatprep.subr.mxu1 %v487_v1 }
  0x24   :  { %442 = vmatpush3.msra.mxu1 %v174_v35 }
  0x25   :  { %443 = vmatprep.subr.mxu1 %v487_v1 }
  0x26   :  { %399 = vmatpush3.xpose.msk.msra.mxu0 %vm38_vm0, %v28_v10  ;;  %444 = vmatpush3.msra.mxu1 %v173_v36 }
  0x27   :  { %400 = vmatprep.subr.mxu0 %v487_v1  ;;  %445 = vmatprep.subr.mxu1 %v487_v1 }
  0x28   :  { %446 = vmatpush3.msra.mxu1 %v172_v37 }
  0x2a   :  { %401 = vmatpush3.xpose.msk.msra.mxu0 %vm38_vm0, %v27_v11 }
  0x2b   :  { %402 = vmatprep.subr.mxu0 %v487_v1 }
  0x2e   :  { %403 = vmatpush3.xpose.msk.msra.mxu0 %vm38_vm0, %v26_v12 }
  0x2f   :  { %404 = vmatprep.subr.mxu0 %v487_v1 }
  0x32   :  { %405 = vmatpush3.xpose.msk.msra.mxu0 %vm38_vm0, %v25_v13 }
  0x33   :  { %406 = vmatprep.subr.mxu0 %v487_v1 }
  0x36   :  { %407 = vmatpush3.xpose.msk.msra.mxu0 %vm38_vm0, %v24_v14 }
  0x37   :  { %408 = vmatprep.subr.mxu0 %v487_v1 }
  0x3a   :  { %409 = vmatpush3.xpose.msk.msra.mxu0 %vm38_vm0, %v23_v15 }
  0x3b   :  { %410 = vmatprep.subr.mxu0 %v487_v1 }
  0x3e   :  { %411 = vmatpush3.xpose.msk.msra.mxu0 %vm38_vm0, %v22_v16 }
  0x41   :  { %413 = vmatmul.mubr.msk.f32.vlgmr.msra.gmra.mxu0 %vm38_vm0, %v21_v17 }
 0x101   :  { %v156_v23 = vpop.f32.mrf.mxu0 }
 0x102   :  { %163 = vmax.xlane.f32.xlu0 %v156_v23  ;;  %v165_v25 = vsel %vm162_vm2, %v156_v23, -1e+30 }
 0x103   :  { %v414_v24 = vpop.f32.mrf.mxu0 }
 0x106   :  { %166 = vmax.xlane.f32.xlu0 %v165_v25 }
 0x18b   :  { %v164_v38 = vpop.xlane.xlu0 %163 }
 0x18f   :  { %v167_v39 = vpop.xlane.xlu0 %166 }
 0x190   :  { %v168_v40 = vsel %vm162_vm2, %v167_v39, %v164_v38  ;;  %v266_v44 = vsub.f32 %v167_v39, %v164_v38 }
 0x191   :  { %v169_v41 = vsub.f32 %v156_v23, %v168_v40 }
 0x192   :  { %v267_v45 = vmul.f32 1.442695, %v266_v44 }
 0x193   :  { %v170_v42 = vmul.f32 1.442695, %v169_v41 }
 0x195   :  { %453 = vpow2.f32 %v170_v42 }
 0x196   :  { %455 = vpow2.f32 %v267_v45 }
 0x1a2   :  { %v454_v43 = vpop.eup %453 }
 0x1a3   :  { %448 = vmatmul.mubr.f32.vlgmr.msra.gmra.mxu1 %v454_v43  ;;  %v456_v46 = vpop.eup %455 }
 0x1a4   :  { %v345_v47 = vadd.f32 -1.0, %v456_v46 }
 0x1a6   :  { %v270_v49 = vmul.f32 %v345_v47, %v161_v48 }
 0x1a8   :  { %v271_v50 = vadd.f32 1.0, %v270_v49 }
 0x263   :  { %v254_v51 = vpop.f32.mrf.mxu1 }
 0x264   :  { %v272_v52 = vmul.f32 %v271_v50, %v254_v51  ;;  %v258_v54 = vmul.f32 %v254_v51, %v161_v48 }
 0x265   :  { %v449_v53 = vpop.f32.mrf.mxu1 }
 0x266   :  { %v273_v55 = vsel %vm259_vm3, %v272_v52, 0.0  ;;  %v260_v56 = vsel %vm259_vm3, %v258_v54, 0.0 }
 0x267   :  { %274 = vadd.xlane.f32.xlu1 %v273_v55 }
 0x26b   :  { %261 = vadd.xlane.f32.xlu1 %v260_v56 }
 0x2f0   :  { %v275_v57 = vpop.xlane.xlu1 %274 }
 0x2f1   :  { %v276_v58 = vmul.f32 %v275_v57, %v161_v48 }
 0x2f3   :  { %v277_v59 = vadd.f32 %v276_v58, %v272_v52 }
 0x2f4   :  { %v262_v20 = vpop.xlane.xlu1 %261 }
 0x2f5   :  { %457 = vlog2.f32 %v277_v59 }
 0x302   :  { %v458_v60 = vpop.eup %457 }
 0x303   :  { %v279_v61 = vmul.f32 0.6931472, %v458_v60 }
 0x305   :  { %v280_v62 = vadd.f32 %v279_v61, %v164_v38 }
 0x307   :  { %v281_v63 = vsel %vm259_vm3, %v280_v62, -inf }
 0x308   :  { %v282_v0 = vrot.slane %v281_v63, 4 }
 0x30a   :  { %v283_v1 = vmax.f32 %v281_v63, %v282_v0 }
 0x30c   :  { %v284_v2 = vrot.slane %v283_v1, 2 }
 0x30e   :  { %v285_v3 = vmax.f32 %v283_v1, %v284_v2 }
 0x310   :  { %v286_v4 = vrot.slane %v285_v3, 1 }
 0x312   :  { %v287_v5 = vmax.f32 %v285_v3, %v286_v4 }
 0x314   :  { %v288_v6 = vsub.f32 %v280_v62, %v287_v5 }
 0x316   :  { %v289_v7 = vmul.f32 1.442695, %v288_v6 }
 0x318   :  { %459 = vpow2.f32 %v289_v7 }
 0x325   :  { %v460_v8 = vpop.eup %459 }
 0x326   :  { %v291_v9 = vsel %vm259_vm3, %v460_v8, 0.0 }
 0x327   :  { %v292_v10 = vrot.slane %v291_v9, 4 }
 0x329   :  { %v293_v11 = vadd.f32 %v292_v10, %v291_v9 }
 0x32b   :  { %v294_v12 = vrot.slane %v293_v11, 2 }
 0x32d   :  { %v295_v13 = vadd.f32 %v294_v12, %v293_v11 }
 0x32f   :  { %v296_v14 = vrot.slane %v295_v13, 1 }
 0x331   :  { %v297_v15 = vadd.f32 %v296_v14, %v295_v13 }
 0x333   :  { %461 = vlog2.f32 %v297_v15 }
 0x334   :  { %463 = vlog2.f32 %v262_v20 }
 0x340   :  { %v462_v16 = vpop.eup %461 }
 0x341   :  { %v299_v17 = vmul.f32 0.6931472, %v462_v16  ;;  %v464_v21 = vpop.eup %463 }
 0x342   :  { %v264_v22 = vmul.f32 0.6931472, %v464_v21 }
 0x343   :  { %v300_v18 = vadd.f32 %v299_v17, %v287_v5 }
 0x344   :  { %v265_v23 = vadd.f32 %v264_v22, %v167_v39 }
 0x345   :  { %v301_v19 = vsel %vm259_vm3, %v300_v18, 0.0 }
 0x346   :  { %302 = vadd.xlane.f32.xlu0 %v301_v19  ;;  %v304_v24 = vrot.slane %v265_v23, 4 }
 0x348   :  { %v305_v25 = vadd.f32 %v304_v24, %v265_v23 }
 0x34a   :  { %v306_v26 = vrot.slane %v305_v25, 2 }
 0x34c   :  { %v307_v27 = vadd.f32 %v306_v26, %v305_v25 }
 0x34e   :  { %v308_v28 = vrot.slane %v307_v27, 1 }
 0x350   :  { %v309_v29 = vadd.f32 %v308_v28, %v307_v27 }
 0x3cf   :  { %v303_v30 = vpop.xlane.xlu0 %302 }
 0x3d0   :  { %v310_v31 = vsub.f32 %v303_v30, %v309_v29 }
 0x3d2   :  { %v311_v32 = vmul.f32 0.125, %v310_v31 }
 0x3d4   :  { %313 = vst.msk [vmem:[#allocation2] sm:$0x1] %vm312_vm4, %v311_v32 }
 0x3d5   :  { %476 = shalt.err (!%p473_p4)
}
 0x3d6   :  { %323 = dma.vmem_to_hbm [thread:$0]  %s321_s7, 16, %s691_s5, [#allocation3]  }
 0x3d7   :  { %485 = dma.done.wait [#allocation3], 16  }
 0x3d8   :  { %486 = vsyncadd [#allocation3], 4294967280 }
 0x3d9   :  { %327 = vsyncpa [#allocation3], 1 }

</bundles_post_ra>
